<compile_context>
chip_gen: v7x
topology: tpu7x:2x2x1
jax: 0.10.0
libtpu: 0.0.40
codegen_flags: <defaults>
</compile_context>

<pallas_src>
import functools

import numpy as np
import jax
import jax.numpy as jnp
from jax import lax
from jax.experimental import pallas as pl
from jax.experimental.pallas import tpu as pltpu


def hamburger_kernel(x_ref, wl_ref, wu_ref, d0_ref, c0_ref, o_ref, *, K, eps):
    # x_ref:  (1, dim, n)        per-batch slab (n already lane-padded)
    # wl_ref: (inner_dim, dim)   lower_bread 1x1-conv weight
    # wu_ref: (dim, inner_dim)   upper_bread 1x1-conv weight
    # d0_ref: (inner_dim, r)     NMF dictionary init (shared across batch)
    # c0_ref: (r, n)             NMF code init (shared across batch)
    x_in = x_ref[0]                                     # (dim, n) f32
    Wl_b = wl_ref[...].astype(jnp.bfloat16)
    Wu_b = wu_ref[...].astype(jnp.bfloat16)

    # lower bread (1x1 conv == channel matmul), then the relu the NMF applies
    # to its input.  Keep y only as a bf16 matmul operand.
    y = jnp.dot(Wl_b, x_in.astype(jnp.bfloat16),
                preferred_element_type=jnp.float32)      # (inner_dim, n)
    y_b = jnp.maximum(y, 0.0).astype(jnp.bfloat16)       # (inner_dim, n) bf16

    D0 = d0_ref[...]                                     # (inner_dim, r) f32
    C0 = c0_ref[...]                                     # (r, n)        f32

    cn_tt = (((0,), (0,)), ((), ()))   # contract leading dims  -> A^T @ B
    cn_nt = (((1,), (1,)), ((), ()))   # contract trailing dims -> A @ B^T

    def nmf_step(_, carry):
        # Both C_new and D_new use the OLD (D, C), matching the PyTorch loop.
        D, C = carry
        Db = D.astype(jnp.bfloat16)
        Cb = C.astype(jnp.bfloat16)

        Dt_y = lax.dot_general(Db, y_b, cn_tt,
                               preferred_element_type=jnp.float32)        # (r, n)
        DtD = lax.dot_general(Db, Db, cn_tt,
                              preferred_element_type=jnp.float32)         # (r, r)
        den_c = jnp.dot(DtD.astype(jnp.bfloat16), Cb,
                        preferred_element_type=jnp.float32) + eps         # (r, n)
        C_new = C * (Dt_y * pl.reciprocal(den_c, approx=True))

        y_Ct = lax.dot_general(y_b, Cb, cn_nt,
                               preferred_element_type=jnp.float32)        # (inner_dim, r)
        CCt = lax.dot_general(Cb, Cb, cn_nt,
                              preferred_element_type=jnp.float32)         # (r, r)
        den_d = jnp.dot(Db, CCt.astype(jnp.bfloat16),
                        preferred_element_type=jnp.float32) + eps         # (inner_dim, r)
        D_new = D * (y_Ct * pl.reciprocal(den_d, approx=True))
        return D_new, C_new

    D, C = lax.fori_loop(0, K, nmf_step, (D0, C0))

    # upper bread fused with the ham:  Wu @ (D @ C) == (Wu @ D) @ C.
    # Avoids materializing the (inner_dim, n) ham and cuts epilogue flops.
    WuD = jnp.dot(Wu_b, D.astype(jnp.bfloat16),
                  preferred_element_type=jnp.float32)                     # (dim, r)
    up = jnp.dot(WuD.astype(jnp.bfloat16), C.astype(jnp.bfloat16),
                 preferred_element_type=jnp.float32)                      # (dim, n)

    # residual connection: input + upper_bread(ham(lower_bread(x)))
    o_ref[0] = x_in + up


def hamburger_forward(x, w_lower, w_upper, D0, C0, *, K=6, eps=2e-8):
    b, dim, H, W = x.shape
    n = H * W
    inner_dim, r = D0.shape
    assert C0.shape == (r, n)

    # Lane/sublane-dense zero padding.  Padded columns of y/C and padded columns
    # of D stay exactly zero through every multiplicative update, so the valid
    # region of the output is unchanged.
    n_pad = max(128, ((n + 127) // 128) * 128)
    r_pad = max(8, ((r + 7) // 8) * 8)

    x_flat = x.reshape(b, dim, n)
    if n_pad != n:
        x_flat = jnp.pad(x_flat, ((0, 0), (0, 0), (0, n_pad - n)))
    D0p = jnp.pad(D0, ((0, 0), (0, r_pad - r))) if r_pad != r else D0
    if r_pad != r or n_pad != n:
        C0p = jnp.pad(C0, ((0, r_pad - r), (0, n_pad - n)))
    else:
        C0p = C0

    kernel = functools.partial(hamburger_kernel, K=K, eps=eps)

    # --- VMEM budget (explicit scoped limit; see review item for v6e) ---------
    f32 = 4
    est = (
        2 * (dim * n_pad * f32)                # x block, double-buffered
        + 2 * (dim * n_pad * f32)              # out block, double-buffered
        + 2 * (inner_dim * dim * f32) * 2      # Wl + Wu (default double-buffer)
        + 2 * (inner_dim * r_pad * f32 + r_pad * n_pad * f32)   # D0 + C0 blocks
        + inner_dim * n_pad * (f32 + 2)        # y (f32 temp) + y bf16 copy
        + 4 * r_pad * n_pad * f32              # C, C_new, numerator, denominator
        + 2 * dim * n_pad * f32                # up + residual temp
    )
    vmem_limit = int(min(max(3 * est, 16 * 1024 * 1024), 48 * 1024 * 1024))

    # --- cost estimate so XLA schedules neighbors sensibly --------------------
    flops_per_b = (
        2 * inner_dim * dim * n_pad
        + K * (4 * inner_dim * r_pad * n_pad      # D^T y  and  y C^T
               + 4 * r_pad * r_pad * n_pad        # DtD@C  and  C C^T
               + 4 * inner_dim * r_pad * r_pad    # D^T D  and  D@CCt
               + 8 * r_pad * n_pad + 8 * inner_dim * r_pad)   # elementwise
        + 2 * dim * inner_dim * r_pad + 2 * dim * r_pad * n_pad + dim * n_pad
    )
    cost = pl.CostEstimate(
        flops=int(b * flops_per_b),
        transcendentals=int(b * 2 * K * (r_pad * n_pad + inner_dim * r_pad)),
        bytes_accessed=int((2 * b * dim * n_pad + 2 * inner_dim * dim
                            + inner_dim * r_pad + r_pad * n_pad) * f32),
    )

    out = pl.pallas_call(
        kernel,
        out_shape=jax.ShapeDtypeStruct((b, dim, n_pad), jnp.float32),
        grid_spec=pltpu.PrefetchScalarGridSpec(
            num_scalar_prefetch=0,
            grid=(b,),
            in_specs=[
                pl.BlockSpec((1, dim, n_pad), lambda i: (i, 0, 0)),
                pl.BlockSpec((inner_dim, dim), lambda i: (0, 0)),
                pl.BlockSpec((dim, inner_dim), lambda i: (0, 0)),
                pl.BlockSpec((inner_dim, r_pad), lambda i: (0, 0)),
                pl.BlockSpec((r_pad, n_pad), lambda i: (0, 0)),
            ],
            out_specs=pl.BlockSpec((1, dim, n_pad), lambda i: (i, 0, 0)),
        ),
        compiler_params=pltpu.CompilerParams(
            dimension_semantics=("parallel",),
            vmem_limit_bytes=vmem_limit,
        ),
        cost_estimate=cost,
    )(x_flat, w_lower, w_upper, D0p, C0p)

    out = out[:, :, :n]
    return out.reshape(b, dim, H, W)


def hamburger_reference(x, w_lower, w_upper, D0, C0, *, K=6, eps=2e-8):
    """Pure-JAX f32 reference mirroring the PyTorch module, for correctness check."""
    b, dim, H, W = x.shape
    n = H * W
    xf = x.reshape(b, dim, n)
    y = jnp.einsum("od,bdn->bon", w_lower, xf)
    y = jnp.maximum(y, 0.0)
    D = jnp.broadcast_to(D0[None], (b,) + D0.shape)
    C = jnp.broadcast_to(C0[None], (b,) + C0.shape)
    for _ in range(K):
        tD = jnp.swapaxes(D, 1, 2)
        tC = jnp.swapaxes(C, 1, 2)
        C_new = C * ((tD @ y) / (tD @ D @ C + eps))
        D_new = D * ((y @ tC) / (D @ C @ tC + eps))
        C, D = C_new, D_new
    ham = D @ C
    up = jnp.einsum("oi,bin->bon", w_upper, ham)
    return x + up.reshape(b, dim, H, W)


if __name__ == "__main__":
    # Small shapes consistent with the module:
    #   dim=16, inner_dim=32, ratio=8 -> r=4, spatial 8x8 -> n=64, K=6
    b, dim, inner_dim, H, W = 2, 16, 32, 8, 8
    ratio, K, eps = 8, 6, 2e-8
    n = H * W
    r = inner_dim // ratio

    key = jax.random.PRNGKey(0)
    k_x, k_wl, k_wu, k_d, k_c = jax.random.split(key, 5)

    x = jax.random.normal(k_x, (b, dim, H, W), dtype=jnp.float32)
    # Conv1d weights (kernel size 1) -> plain (out, in) matrices, small uniform init.
    w_lower = jax.random.uniform(k_wl, (inner_dim, dim), jnp.float32, -0.25, 0.25)
    w_upper = jax.random.uniform(k_wu, (dim, inner_dim), jnp.float32, -0.25, 0.25)
    # NMF parameters: uniform(0, 1), as in torch .uniform_(0, 1)
    D0 = jax.random.uniform(k_d, (inner_dim, r), jnp.float32, 0.0, 1.0)
    C0 = jax.random.uniform(k_c, (r, n), jnp.float32, 0.0, 1.0)

    out = hamburger_forward(x, w_lower, w_upper, D0, C0, K=K, eps=eps)
    out = jax.block_until_ready(out)

    ref = jax.block_until_ready(
        hamburger_reference(x, w_lower, w_upper, D0, C0, K=K, eps=eps)
    )
    # bf16 MXU operands + approx reciprocal vs. pure-f32 reference -> 2e-2 tolerance.
    np.testing.assert_allclose(np.asarray(out), np.asarray(ref), rtol=2e-2, atol=2e-2)

    print("KERNEL_OK")
</pallas_src>

<mosaic_0001>
module attributes {stable_mosaic.version = 11 : i64} {
  func.func @hamburger_kernel(%arg0: i32, %arg1: memref<1x16x128xf32, #tpu.memory_space<vmem>>, %arg2: memref<32x16xf32, #tpu.memory_space<vmem>>, %arg3: memref<16x32xf32, #tpu.memory_space<vmem>>, %arg4: memref<32x8xf32, #tpu.memory_space<vmem>>, %arg5: memref<8x128xf32, #tpu.memory_space<vmem>>, %arg6: memref<1x16x128xf32, #tpu.memory_space<vmem>>) attributes {dimension_semantics = [#tpu.dimension_semantics<parallel>], iteration_bounds = array<i64: 2>, scalar_prefetch = 0 : i64, scratch_operands = 0 : i64, tpu.core_type = #tpu.core_type<tc>, window_params = [{transform_indices = @transform_0, window_bounds = array<i64: 1, 16, 128>}, {pipeline_mode = #tpu.pipeline_mode<synchronous>, transform_indices = @transform_1, window_bounds = array<i64: 32, 16>}, {pipeline_mode = #tpu.pipeline_mode<synchronous>, transform_indices = @transform_2, window_bounds = array<i64: 16, 32>}, {pipeline_mode = #tpu.pipeline_mode<synchronous>, transform_indices = @transform_3, window_bounds = array<i64: 32, 8>}, {pipeline_mode = #tpu.pipeline_mode<synchronous>, transform_indices = @transform_4, window_bounds = array<i64: 8, 128>}, {transform_indices = @transform_5, window_bounds = array<i64: 1, 16, 128>}]} {
    %c0 = arith.constant 0 : index
    %c0_0 = arith.constant 0 : index
    %c0_1 = arith.constant 0 : index
    %0 = vector.load %arg1[%c0, %c0_0, %c0_1] : memref<1x16x128xf32, #tpu.memory_space<vmem>>, vector<1x16x128xf32>
    %1 = vector.shape_cast %0 : vector<1x16x128xf32> to vector<16x128xf32>
    %c0_2 = arith.constant 0 : index
    %c0_3 = arith.constant 0 : index
    %2 = vector.load %arg2[%c0_2, %c0_3] : memref<32x16xf32, #tpu.memory_space<vmem>>, vector<32x16xf32>
    %3 = arith.truncf %2 : vector<32x16xf32> to vector<32x16xbf16>
    %c0_4 = arith.constant 0 : index
    %c0_5 = arith.constant 0 : index
    %4 = vector.load %arg3[%c0_4, %c0_5] : memref<16x32xf32, #tpu.memory_space<vmem>>, vector<16x32xf32>
    %5 = arith.truncf %4 : vector<16x32xf32> to vector<16x32xbf16>
    %6 = arith.truncf %1 : vector<16x128xf32> to vector<16x128xbf16>
    %cst = arith.constant dense<0.000000e+00> : vector<32x128xf32>
    %7 = tpu.matmul %3, %6, %cst {dimension_numbers = #tpu.dot_dimension_numbers<[1], [0], [0], [1], [0, 0, 1, 1], [], []>} : vector<32x16xbf16>, vector<16x128xbf16>, vector<32x128xf32> -> vector<32x128xf32>
    %cst_6 = arith.constant 0.000000e+00 : f32
    %8 = vector.broadcast %cst_6 : f32 to vector<32x128xf32>
    %9 = arith.maximumf %7, %8 : vector<32x128xf32>
    %10 = arith.truncf %9 : vector<32x128xf32> to vector<32x128xbf16>
    %c0_7 = arith.constant 0 : index
    %c0_8 = arith.constant 0 : index
    %11 = vector.load %arg4[%c0_7, %c0_8] : memref<32x8xf32, #tpu.memory_space<vmem>>, vector<32x8xf32>
    %c0_9 = arith.constant 0 : index
    %c0_10 = arith.constant 0 : index
    %12 = vector.load %arg5[%c0_9, %c0_10] : memref<8x128xf32, #tpu.memory_space<vmem>>, vector<8x128xf32>
    %c0_i32 = arith.constant 0 : i32
    %c6_i32 = arith.constant 6 : i32
    %13 = arith.addi %c0_i32, %c6_i32 : i32
    %c1_i32 = arith.constant 1 : i32
    %14:2 = scf.for %arg7 = %c0_i32 to %13 step %c1_i32 iter_args(%arg8 = %11, %arg9 = %12) -> (vector<32x8xf32>, vector<8x128xf32>)  : i32 {
      %24 = arith.truncf %arg8 : vector<32x8xf32> to vector<32x8xbf16>
      %25 = arith.truncf %arg9 : vector<8x128xf32> to vector<8x128xbf16>
      %cst_16 = arith.constant dense<0.000000e+00> : vector<8x128xf32>
      %26 = tpu.matmul %24, %10, %cst_16 {dimension_numbers = #tpu.dot_dimension_numbers<[0], [0], [1], [1], [0, 1, 1, 1], [], []>} : vector<32x8xbf16>, vector<32x128xbf16>, vector<8x128xf32> -> vector<8x128xf32>
      %cst_17 = arith.constant dense<0.000000e+00> : vector<8x8xf32>
      %27 = tpu.matmul %24, %24, %cst_17 {dimension_numbers = #tpu.dot_dimension_numbers<[0], [0], [1], [1], [0, 1, 1, 1], [], []>} : vector<32x8xbf16>, vector<32x8xbf16>, vector<8x8xf32> -> vector<8x8xf32>
      %28 = arith.truncf %27 : vector<8x8xf32> to vector<8x8xbf16>
      %cst_18 = arith.constant dense<0.000000e+00> : vector<8x128xf32>
      %29 = tpu.matmul %28, %25, %cst_18 {dimension_numbers = #tpu.dot_dimension_numbers<[1], [0], [0], [1], [0, 0, 1, 1], [], []>} : vector<8x8xbf16>, vector<8x128xbf16>, vector<8x128xf32> -> vector<8x128xf32>
      %cst_19 = arith.constant 2.000000e-08 : f32
      %30 = vector.broadcast %cst_19 : f32 to vector<8x128xf32>
      %31 = arith.addf %29, %30 : vector<8x128xf32>
      %32 = tpu.reciprocal %31 {approx = true} : vector<8x128xf32> -> vector<8x128xf32>
      %33 = arith.mulf %26, %32 : vector<8x128xf32>
      %34 = arith.mulf %arg9, %33 : vector<8x128xf32>
      %cst_20 = arith.constant dense<0.000000e+00> : vector<32x8xf32>
      %35 = tpu.matmul %10, %25, %cst_20 {dimension_numbers = #tpu.dot_dimension_numbers<[1], [1], [0], [0], [0, 0, 1, 0], [], []>} : vector<32x128xbf16>, vector<8x128xbf16>, vector<32x8xf32> -> vector<32x8xf32>
      %cst_21 = arith.constant dense<0.000000e+00> : vector<8x8xf32>
      %36 = tpu.matmul %25, %25, %cst_21 {dimension_numbers = #tpu.dot_dimension_numbers<[1], [1], [0], [0], [0, 0, 1, 0], [], []>} : vector<8x128xbf16>, vector<8x128xbf16>, vector<8x8xf32> -> vector<8x8xf32>
      %37 = arith.truncf %36 : vector<8x8xf32> to vector<8x8xbf16>
      %cst_22 = arith.constant dense<0.000000e+00> : vector<32x8xf32>
      %38 = tpu.matmul %24, %37, %cst_22 {dimension_numbers = #tpu.dot_dimension_numbers<[1], [0], [0], [1], [0, 0, 1, 1], [], []>} : vector<32x8xbf16>, vector<8x8xbf16>, vector<32x8xf32> -> vector<32x8xf32>
      %cst_23 = arith.constant 2.000000e-08 : f32
      %39 = vector.broadcast %cst_23 : f32 to vector<32x8xf32>
      %40 = arith.addf %38, %39 : vector<32x8xf32>
      %41 = tpu.reciprocal %40 {approx = true} : vector<32x8xf32> -> vector<32x8xf32>
      %42 = arith.mulf %35, %41 : vector<32x8xf32>
      %43 = arith.mulf %arg8, %42 : vector<32x8xf32>
      scf.yield %43, %34 : vector<32x8xf32>, vector<8x128xf32>
    }
    %15 = arith.truncf %14#0 : vector<32x8xf32> to vector<32x8xbf16>
    %cst_11 = arith.constant dense<0.000000e+00> : vector<16x8xf32>
    %16 = tpu.matmul %5, %15, %cst_11 {dimension_numbers = #tpu.dot_dimension_numbers<[1], [0], [0], [1], [0, 0, 1, 1], [], []>} : vector<16x32xbf16>, vector<32x8xbf16>, vector<16x8xf32> -> vector<16x8xf32>
    %17 = arith.truncf %16 : vector<16x8xf32> to vector<16x8xbf16>
    %18 = arith.truncf %14#1 : vector<8x128xf32> to vector<8x128xbf16>
    %cst_12 = arith.constant dense<0.000000e+00> : vector<16x128xf32>
    %19 = tpu.matmul %17, %18, %cst_12 {dimension_numbers = #tpu.dot_dimension_numbers<[1], [0], [0], [1], [0, 0, 1, 1], [], []>} : vector<16x8xbf16>, vector<8x128xbf16>, vector<16x128xf32> -> vector<16x128xf32>
    %20 = arith.addf %1, %19 : vector<16x128xf32>
    %c0_13 = arith.constant 0 : index
    %c0_14 = arith.constant 0 : index
    %c0_15 = arith.constant 0 : index
    %21 = vector.load %arg6[%c0_13, %c0_14, %c0_15] : memref<1x16x128xf32, #tpu.memory_space<vmem>>, vector<1x16x128xf32>
    %22 = vector.shape_cast %21 : vector<1x16x128xf32> to vector<16x128xf32>
    %23 = vector.shape_cast %20 : vector<16x128xf32> to vector<1x16x128xf32>
    tpu.vector_store %arg6[%c0_13, %c0_14, %c0_15], %23 {strides = array<i32>} : memref<1x16x128xf32, #tpu.memory_space<vmem>>, vector<1x16x128xf32>,
    return
  }
  func.func @transform_0(%arg0: i32) -> (i32, i32, i32) {
    %c0_i32 = arith.constant 0 : i32
    %c0_i32_0 = arith.constant 0 : i32
    %c0_i32_1 = arith.constant 0 : i32
    return %arg0, %c0_i32, %c0_i32_0 : i32, i32, i32
  }
  func.func @transform_1(%arg0: i32) -> (i32, i32) {
    %c0_i32 = arith.constant 0 : i32
    %c0_i32_0 = arith.constant 0 : i32
    %c0_i32_1 = arith.constant 0 : i32
    return %c0_i32, %c0_i32_0 : i32, i32
  }
  func.func @transform_2(%arg0: i32) -> (i32, i32) {
    %c0_i32 = arith.constant 0 : i32
    %c0_i32_0 = arith.constant 0 : i32
    %c0_i32_1 = arith.constant 0 : i32
    return %c0_i32, %c0_i32_0 : i32, i32
  }
  func.func @transform_3(%arg0: i32) -> (i32, i32) {
    %c0_i32 = arith.constant 0 : i32
    %c0_i32_0 = arith.constant 0 : i32
    %c0_i32_1 = arith.constant 0 : i32
    return %c0_i32, %c0_i32_0 : i32, i32
  }
  func.func @transform_4(%arg0: i32) -> (i32, i32) {
    %c0_i32 = arith.constant 0 : i32
    %c0_i32_0 = arith.constant 0 : i32
    %c0_i32_1 = arith.constant 0 : i32
    return %c0_i32, %c0_i32_0 : i32, i32
  }
  func.func @transform_5(%arg0: i32) -> (i32, i32, i32) {
    %c0_i32 = arith.constant 0 : i32
    %c0_i32_0 = arith.constant 0 : i32
    %c0_i32_1 = arith.constant 0 : i32
    return %arg0, %c0_i32, %c0_i32_0 : i32, i32, i32
  }
}

</mosaic_0001>

<bundles_post_ra>
// kernel: tpu_custom_call.1
= control target key start
LH: loop header
LB: loop body
LE: loop exit
PB: predicated region body
PF: predicated region fallthrough
CT: control target
= control target key end

     0   :  { %10 = vsyncpa [#allocation3], 0  ;;  %s1430_s0 = inlined_call_operand.vmem [shape: f32[2,16,128], index: 0, kind: input, shape index: {}]   ;;  %s1431_s1 = inlined_call_operand.vmem [shape: f32[32,16], index: 1, kind: input, shape index: {}]   ;;  %s1432_s2 = inlined_call_operand.vmem [shape: f32[16,32], index: 2, kind: input, shape index: {}]   ;;  %s1433_s3 = inlined_call_operand.vmem [shape: f32[32,8], index: 3, kind: input, shape index: {}]   ;;  %s1434_s4 = inlined_call_operand.vmem [shape: f32[8,128], index: 4, kind: input, shape index: {}]   ;;  %s1435_s5 = inlined_call_operand.hbm [shape: f32[2,16,128], index: 5, kind: output, shape index: {}]  }
   0x1   :  { %12 = vsyncpa [#allocation3 + $0x1], 0  ;;  %s1188_s18 = smov 0   ;;  %s1190_s19 = smov 0  }
   0x2   :  { %s1192_s20 = smov 0   ;;  %s1194_s21 = smov 0  }
   0x3 LB: > { %s1209_s22 = sadd.s32 4294967295, %s1125_s21   ;;  %s827_s23 = sadd.s32 4294967294, %s1125_s21   ;;  %s1125_s21 = sphi %s1194_s21, %s1446_s21   ;;  %s1121_s20 = sphi %s1192_s20, %s1445_s20   ;;  %s1117_s19 = sphi %s1190_s19, %s1444_s19   ;;  %s1113_s18 = sphi %s1188_s18, %s1443_s18  }
   0x4   : > { %s1213_s24 = sadd.s32 1, %s1125_s21   ;;  %s135_s25 = sadd.s32 1, %s1121_s20 }
   0x5   : > { %s132_s26 = ssub.s32 %s1125_s21, %s1213_s24  ;;  %p145_p0 = scmp.ne.s32.totalorder %s1121_s20, %s1117_s19 }
   0x6   : > { %p133_p1 = scmp.eq.s32.totalorder %s132_s26, 0  ;;  %p146_p2 = scmp.eq.s32.totalorder %s1209_s22, 1 }
   0x7   : > { %p151_p3 = scmp.ne.s32.totalorder %s1117_s19, %s1113_s18  ;;  %p152_p4 = scmp.eq.s32.totalorder %s827_s23, 1 }
   0x8   : > { %s1224_s27 = scalar_select %p133_p1, %s1121_s20, %s135_s25  }
   0x9   : > { %p1226_p5 = por %p146_p2, %p145_p0  ;;  %p1230_p6 = por %p152_p4, %p151_p3 }
   0xa   : > { %p830_p7 = scmp.ge.s32.totalorder %s1125_s21, 1  ;;  %p190_p8 = scmp.lt.s32.totalorder %s1125_s21, 3 }
   0xc   : > { %p191_p9 = pnand %p830_p7, %p190_p8 }
   0xd   : > { %s215_s30 = sand.u32 (!%p191_p9), 1, %s1117_s19   ;;  %p218_p10 = scmp.lt.s32.totalorder (!%p191_p9), %s1209_s22, 1  ;;  %v1241_v0 = vld [vmem:[%s1432_s2] sm:$0xff] (!%p191_p9)  ;;  %v1246_v1 = vld [vmem:[%s1432_s2 + $0x8] sm:$0xff] (!%p191_p9)  ;;  %vm236_vm0 = vcmask (!%p191_p9), 130048   ;;  %v228_v6 = vld [vmem:[%s1431_s1 + $0x10] sm:$0xff] (!%p191_p9) }
   0xe   : > { %194 = sbr.rel (%p191_p9) target bundleno = 1483 (0x5cb), region = 40  ;;  %v226_v2 = vld [vmem:[%s1431_s1] sm:$0xff] (!%p191_p9)  ;;  %s1253_s12 = sshll.u32 (!%p191_p9), %s215_s30, 4  ;;  %v234_v3 = vpack.c.bf16 (!%p191_p9), %v1246_v1, %v1241_v0  ;;  %v227_v4 = vld [vmem:[%s1431_s1 + $0x8] sm:$0xff] (!%p191_p9)  ;;  %v229_v9 = vld [vmem:[%s1431_s1 + $0x18] sm:$0xff] (!%p191_p9) }
   0xf   : > { %v230_v5 = vpack.c.bf16 (!%p191_p9), %v227_v4, %v226_v2  ;;  %v231_v11 = vpack.c.bf16 (!%p191_p9), %v229_v9, %v228_v6  ;;  %v298_v12 = vld [vmem:[%s1433_s3] sm:$0xff] (!%p191_p9)   ;;  %v299_v13 = vld [vmem:[%s1433_s3 + $0x8] sm:$0xff] (!%p191_p9)   ;;  %v300_v14 = vld [vmem:[%s1433_s3 + $0x10] sm:$0xff] (!%p191_p9)   ;;  %s1296_s26 = scalar_lea.vmem (!%p191_p9), [#allocation2], %s1253_s12  ;;  %s1308_s6 = smov (!%p191_p9), 0  }
  0x10   : > { %v301_v15 = vld [vmem:[%s1433_s3 + $0x18] sm:$0xff] (!%p191_p9)   ;;  %v302_v16 = vld [vmem:[%s1434_s4] sm:$0xff] (!%p191_p9)  }
  0x11   : > { %876 = vmatprep.mubr.msk.bf16.mxu0 (!%p191_p9), %vm236_vm0, %v230_v5 }
  0x15   : > { %s219_s15 = scalar_select %p218_p10, %s1209_s22, 1 }
  0x17   : > { %s848_s16 = sshll.u32 %s219_s15, 4 }
  0x18   : > { %s222_s25 = scalar_lea.vmem %s1430_s0, %s848_s16 }
  0x19   : > { %v1267_v7 = vld [vmem:[%s222_s25] sm:$0xff]  ;;  %v1269_v8 = vld [vmem:[%s222_s25 + $0x8] sm:$0xff] }
  0x1a   : > { %v235_v10 = vpack.c.bf16 %v1269_v8, %v1267_v7 }
  0x1c   : > { %874 = vmatprep.subr.bf16.mxu0 %v235_v10 }
  0x1d   : > { %875 = vmatpush3.bf16.msra.mxu0 %v235_v10 }
  0x20   : > { %877 = vmatmul.mubr.msk.bf16.vlgmr.msra.gmra.mrb[0].mxu0 %vm236_vm0, %v231_v11 }
  0xf3   : > { %v878_v17 = vpop.f32.mrb[0].mxu0 }
  0xf4   : > { %v277_v18 = vpop.f32.mrb[1].mxu0  ;;  %v294_v20 = vmax.f32 %v878_v17, 0.0 }
  0xf5   : > { %v879_v19 = vpop.f32.mrb[2].mxu0  ;;  %v292_v23 = vmax.f32 %v277_v18, 0.0 }
  0xf6   : > { %v295_v21 = vmax.f32 %v879_v19, 0.0  ;;  %v280_v22 = vpop.f32.mrb[3].mxu0 }
  0xf7   : > { %v293_v24 = vmax.f32 %v280_v22, 0.0 }
  0xf8   : > { %v1291_v25 = vpack.c.bf16 %v295_v21, %v294_v20 }
  0xf9   : > { %v1293_v26 = vpack.c.bf16 %v293_v24, %v292_v23 }
  0xfa LB: >> { %v314_v27 = vpack.c.bf16 %v1141_v13, %v1145_v12  ;;  %v1151_v28 = vmov 0.0   ;;  %v315_v29 = vpack.c.bf16 %v1133_v15, %v1137_v14  ;;  %vm1152_vm1 = vmmov 0   ;;  %s308_s6 = sadd.s32 1, %s1149_s6   ;;  %s1149_s6 = sphi %s1308_s6, %s308_s6   ;;  %v1145_v12 = vphi %v298_v12, %v1442_v12   ;;  %v1141_v13 = vphi %v299_v13, %v1441_v13   ;;  %v1137_v14 = vphi %v300_v14, %v1440_v14   ;;  %v1133_v15 = vphi %v301_v15, %v1439_v15   ;;  %v1129_v16 = vphi %v302_v16, %v1438_v16  }
  0xfb   : >> { %880 = vmatprep.subr.bf16.mxu0 %v1151_v28  ;;  %888 = vmatprep.subr.bf16.mxu1 %v1151_v28  ;;  %v316_v30 = vpack.c.bf16 %v1129_v16, %v1129_v16  ;;  %vm422_vm2 = vcmask 1043456   ;;  %vm333_vm3 = vcmask 261120   ;;  %vm418_vm4 = vcmask 64512   ;;  %p305_p11 = scmp.ge.s32.totalorder %s308_s6, 6  }
  0xfc   : >> { %317 = vxpose.xlu0.c.b16.start [1/2] (short) (narrow) %v314_v27, 16  ;;  %881 = vmatpush3.bf16.msra.mxu0 %v1293_v26  ;;  %vm1154_vm5 = vmmov (%p305_p11), 0   ;;  %s849_s12 = sshll.u32 (%p305_p11), %s1209_s22, 8  ;;  %s745_s7 = sshll.u32 (%p305_p11), %s1296_s26, 4  ;;  %s1382_s7 = int_to_ptr.vmem [resolvable:$true] %s745_s7 }
  0xfd   : >> { %889 = vmatpush3.bf16.msra.mxu1 %v314_v27  ;;  %882 = vmatprep.subr.bf16.mxu0 %v1151_v28  ;;  %v424_v31 = vsel %vm422_vm2, %v316_v30, 0  ;;  %s1380_s10 = scalar_lea.hbm (%p305_p11), %s1435_s5, %s849_s12  ;;  %s1389_s22 = scalar_lea.sflag (%p305_p11), [#allocation3], %s215_s30 }
  0xfe   : >> { %890 = vmatprep.subr.bf16.mxu1 %v1151_v28  ;;  %884 = vmatprep.mubr.msk.bf16.mxu0 %vm1152_vm1, %v1151_v28  ;;  %s1039_s11 = scalar_lea.vmem (%p305_p11), %s1382_s7, 256  ;;  %s1155_s13 = smov (%p305_p11), [#allocation2]  }
  0xff   : >> { %892 = vmatprep.mubr.msk.bf16.mxu1 %vm1152_vm1, %v1151_v28  ;;  %p1040_p12 = scmp.ne.s32.totalorder (%p305_p11), %s1382_s7, %s1039_s11  ;;  %s1043_s14 = sshll.u32 (%p305_p11), %s1155_s13, 4  ;;  %s1044_s14 = int_to_ptr.vmem [resolvable:$false] %s1043_s14 }
 0x100   : >> { %318 = vxpose.xlu0.c.b16.end [2/2] (short) (narrow) %v315_v29, 16  ;;  %883 = vmatpush3.bf16.msra.mxu0 %v1291_v25  ;;  %s1045_s15 = scalar_lea.vmem (%p305_p11), %s1044_s14, 512  ;;  %p1046_p1 = scmp.lt.s32.totalorder (%p305_p11), %s1382_s7, %s1044_s14 }
 0x101   : >> { %891 = vmatpush3.bf16.msra.mxu1 %v315_v29  ;;  %896 = vmatprep.subr.bf16.mxu0 %v1151_v28  ;;  %p1041_p13 = pnand (%p305_p11), %p1040_p12, %p1226_p5  ;;  %p1047_p2 = scmp.lt.s32.totalorder (%p305_p11), %s1045_s15, %s1039_s11 }
 0x102   : >> { %902 = vmatprep.subr.bf16.mxu1 %v316_v30 }
 0x103   : > { %p1042_p0 = pneg (%p305_p11), %p1041_p13  ;;  %p1048_p3 = por (%p305_p11), %p1047_p2, %p1046_p1 }
 0x105   : > { %p1049_p4 = pnand (%p305_p11), %p1048_p3, %p1042_p0 }
 0x162   : >> { %v325_v32 = vpop.trf.xlu0 }
 0x163   : >> { %885 = vmatmul.mubr.msk.bf16.vlgmr.msra.gmra.mrb[0].mxu0 %vm333_vm3, %v325_v32  ;;  %893 = vmatmul.mubr.msk.bf16.vlgmr.msra.gmra.mrb[0].mxu1 %vm333_vm3, %v325_v32 }
 0x164   : >> { %897 = vmatpush3.bf16.msra.mxu0 %v424_v31  ;;  %898 = vmatprep.mubr.msk.bf16.mxu0 %vm1152_vm1, %v1151_v28 }
 0x165   : >> { %908 = vmatprep.subr.bf16.mxu0 %v1151_v28  ;;  %903 = vmatpush3.bf16.xpose.msra.mxu1 %v316_v30 }
 0x166   : >> { %904 = vmatprep.mubr.bf16.mxu1 %v1293_v26 }
 0x16c   : >> { %905 = vmatmul.mubr.bf16.vlgmr.msra.gmra.mrb[4].mxu1 %v1291_v25 }
 0x16d   : >> { %916 = vmatprep.mubr.msk.bf16.mxu1 %vm418_vm4, %v314_v27  ;;  %v1153_v27 = vmov (%p305_p11), 0.0  }
 0x236   : >> { %v371_v33 = vpop.f32.mrb[0].mxu0  ;;  %v411_v34 = vpop.f32.mrb[0].mxu1 }
 0x237   : >> { %v417_v35 = vpack.c.bf16 %v411_v34, %v411_v34  ;;  %v886_v36 = vpop.f32.mrb[1].mxu0  ;;  %v894_v37 = vpop.f32.mrb[1].mxu1 }
 0x238   : >> { %v374_v38 = vpop.f32.mrb[2].mxu0  ;;  %v414_v39 = vpop.f32.mrb[2].mxu1 }
 0x239   : >> { %v887_v40 = vpop.f32.mrb[3].mxu0  ;;  %v895_v41 = vpop.f32.mrb[3].mxu1  ;;  %899 = vmatmul.mubr.msk.bf16.vlgmr.msra.gmra.mrb[4].mxu0 %vm418_vm4, %v417_v35 }
 0x23a   : >> { %909 = vmatpush3.bf16.xpose.msra.mxu0 %v316_v30  ;;  %910 = vmatprep.mubr.msk.bf16.mxu0 %vm1152_vm1, %v1151_v28 }
 0x23b   : > { %920 = vmatprep.subr.bf16.mxu0 (%p305_p11), %v1153_v27 }
 0x23f   : >> { %v906_v42 = vpop.f32.mrb[4].mxu1 }
 0x240   : >> { %v503_v43 = vpop.f32.mrb[5].mxu1 }
 0x241   : >> { %911 = vmatmul.mubr.bf16.vlgmr.msra.gmra.mrb[8].mxu0 %v316_v30  ;;  %v907_v44 = vpop.f32.mrb[6].mxu1 }
 0x242   : >> { %v506_v45 = vpop.f32.mrb[7].mxu1  ;;  %924 = vmatprep.mubr.msk.bf16.mxu0 (%p305_p11), %vm1154_vm5, %v1153_v27 }
 0x30c   : >> { %v460_v46 = vpop.f32.mrb[4].mxu0 }
 0x30d   : >> { %v461_v47 = vadd.f32 2e-08, %v460_v46  ;;  %v900_v48 = vpop.f32.mrb[5].mxu0 }
 0x30e   : >> { %v463_v49 = vpop.f32.mrb[6].mxu0 }
 0x30f   : >> { %1029 = vrcp.f32 %v461_v47  ;;  %v901_v50 = vpop.f32.mrb[7].mxu0 }
 0x314   : >> { %v552_v51 = vpop.f32.mrb[8].mxu0 }
 0x315   : >> { %v558_v52 = vpack.c.bf16 %v552_v51, %v552_v51  ;;  %v912_v53 = vpop.f32.mrb[9].mxu0 }
 0x316   : >> { %v555_v54 = vpop.f32.mrb[10].mxu0 }
 0x317   : >> { %v566_v55 = vsel %vm422_vm2, %v558_v52, 0  ;;  %v913_v56 = vpop.f32.mrb[11].mxu0  ;;  %934 = vmatprep.subr.msk.bf16.mxu1 %vm422_vm2, %v558_v52 }
 0x318   : >> { %915 = vmatpush3.bf16.msra.mxu1 %v566_v55 }
 0x319   : >> { %v1030_v57 = vpop.eup %1029  ;;  %928 = vmatprep.subr.bf16.mxu1 (%p305_p11), %v1153_v27 }
 0x31a   : >> { %v467_v58 = vmul.f32 %v1030_v57, %v371_v33 }
 0x31b   : >> { %917 = vmatmul.mubr.msk.bf16.vlgmr.msra.gmra.mrb[8].mxu1 %vm418_vm4, %v315_v29 }
 0x31c   : >> { %v468_v59 = vmul.f32 %v1129_v16, %v467_v58   ;;  %930 = vmatprep.mubr.msk.bf16.mxu1 (%p305_p11), %vm1154_vm5, %v1153_v27 }
 0x31e   : > { %v677_v29 = vpack.c.bf16 (%p305_p11), %v468_v59, %v468_v59 }
 0x3ee   : >> { %v918_v60 = vpop.f32.mrb[8].mxu1 }
 0x3ef   : >> { %v611_v61 = vadd.f32 2e-08, %v918_v60  ;;  %v602_v62 = vpop.f32.mrb[9].mxu1 }
 0x3f0   : >> { %v603_v63 = vadd.f32 2e-08, %v602_v62  ;;  %v919_v2 = vpop.f32.mrb[10].mxu1 }
 0x3f1   : >> { %1031 = vrcp.f32 %v611_v61  ;;  %v614_v4 = vadd.f32 2e-08, %v919_v2  ;;  %v605_v5 = vpop.f32.mrb[11].mxu1 }
 0x3f2   : >> { %1033 = vrcp.f32 %v603_v63  ;;  %v606_v6 = vadd.f32 2e-08, %v605_v5 }
 0x3f3   : >> { %1035 = vrcp.f32 %v614_v4 }
 0x3f4   : >> { %1037 = vrcp.f32 %v606_v6 }
 0x3fb   : >> { %v1032_v9 = vpop.eup %1031 }
 0x3fc   : >> { %v1034_v10 = vpop.eup %1033  ;;  %v623_v11 = vmul.f32 %v1032_v9, %v906_v42 }
 0x3fd   : >> { %v1036_v17 = vpop.eup %1035  ;;  %v621_v18 = vmul.f32 %v1034_v10, %v503_v43  ;;  %307 = sbr.rel (!%p305_p11) target bundleno = 250 (0xfa), region = 82 }
 0x3fe   : >> { %v1038_v19 = vpop.eup %1037  ;;  %v627_v20 = vmul.f32 %v1137_v14, %v623_v11   ;;  %v624_v16 = vmul.f32 %v1036_v17, %v907_v44 }
 0x3ff   : >> { %v625_v21 = vmul.f32 %v1145_v12, %v621_v18   ;;  %v622_v22 = vmul.f32 %v1038_v19, %v506_v45 }
 0x400   : >> { %v628_v23 = vmul.f32 %v1133_v15, %v624_v16   ;;  %v1438_v16 = vmov %v468_v59  ;;  %v1440_v14 = vmov %v627_v20 }
 0x401   : >> { %v626_v24 = vmul.f32 %v1141_v13, %v622_v22   ;;  %v1442_v12 = vmov %v625_v21 }
 0x402   : >> { %v1439_v15 = vmov %v628_v23  ;;  %v630_v28 = vpack.c.bf16 (%p305_p11), %v628_v23, %v627_v20 }
 0x403   : >> { %v1441_v13 = vmov %v626_v24  ;;  %v629_v12 = vpack.c.bf16 (%p305_p11), %v626_v24, %v625_v21 }
 0x404   : > { %v684_v13 = vsel %vm422_vm2, %v677_v29, 0 }
 0x405   : > { %921 = vmatpush3.bf16.msra.mxu0 %v629_v12  ;;  %929 = vmatpush3.bf16.msra.mxu1 %v684_v13 }
 0x406   : > { %922 = vmatprep.subr.bf16.mxu0 %v1153_v27 }
 0x409   : > { %923 = vmatpush3.bf16.msra.mxu0 %v630_v28 }
 0x40c   : > { %925 = vmatmul.mubr.msk.bf16.vlgmr.msra.gmra.mrb[0].mxu0 %vm333_vm3, %v234_v3 }
 0x4df   : > { %v669_v14 = vpop.f32.mrb[0].mxu0 }
 0x4e0   : > { %v926_v15 = vpop.f32.mrb[1].mxu0 }
 0x4e1   : > { %v672_v25 = vpop.f32.mrb[2].mxu0 }
 0x4e2   : > { %v676_v26 = vpack.c.bf16 %v672_v25, %v669_v14  ;;  %v927_v30 = vpop.f32.mrb[3].mxu0 }
 0x4e4   : > { %931 = vmatmul.mubr.msk.bf16.vlgmr.msra.gmra.mrb[0].mxu1 %vm418_vm4, %v676_v26 }
 0x5b7   : > { %v720_v0 = vpop.f32.mrb[0].mxu1 }
 0x5b8   : > { %v727_v1 = vadd.f32 %v720_v0, %v1267_v7  ;;  %v932_v3 = vpop.f32.mrb[1].mxu1 }
 0x5b9   : > { %v723_v31 = vpop.f32.mrb[2].mxu1 }
 0x5ba   : > { %729 = vst [vmem:[%s1296_s26] sm:$0xff] %v727_v1  ;;  %v728_v32 = vadd.f32 %v723_v31, %v1269_v8  ;;  %v933_v33 = vpop.f32.mrb[3].mxu1 }
 0x5bc   : > { %730 = vst [vmem:[%s1296_s26 + $0x8] sm:$0xff] %v728_v32 }
 0x5bd   : > { %1052 = shalt.err (!%p1049_p4)
}
 0x5be   : > { %s1053_s30 = scalar_lea.hbm %s1380_s10, 256  ;;  %s1057_s23 = scalar_lea.hbm %s1435_s5, 512 }
 0x5bf   : > { %p1054_p7 = scmp.ne.s32.totalorder %s1380_s10, %s1053_s30  ;;  %p1058_p10 = scmp.lt.u32.totalorder %s1380_s10, %s1435_s5 }
 0x5c0   : > { %p1059_p11 = scmp.lt.u32.totalorder %s1057_s23, %s1053_s30  ;;  %p1061_p13 = scmp.lt.u32.totalorder %s1053_s30, %s1380_s10 }
 0x5c1   : > { %p1055_p8 = pnand %p1054_p7, %p1226_p5 }
 0x5c2   : > { %p1060_p12 = por %p1059_p11, %p1058_p10 }
 0x5c3   : > { %p1056_p9 = pneg %p1055_p8 }
 0x5c4   : > { %p1062_p0 = por %p1061_p13, %p1060_p12 }
 0x5c6   : > { %p1063_p1 = pnand %p1062_p0, %p1056_p9 }
 0x5c8   : > { %1066 = shalt.err (!%p1063_p1)
}
 0x5c9   : > { %s1156_s6 = smov 128   ;;  %s1157_s12 = smov 8  }
 0x5ca   : > { %935 = dma.vmem_to_hbm [thread:$0]  (%p1226_p5), %s1382_s7, 256, %s1380_s10, %s1389_s22, %s1156_s6, %s1156_s6, %s1157_s12  }
 0x5cb PF: > { %p941_p2 = scmp.ge.s32.totalorder %s1125_s21, 2  ;;  %s760_s8 = sand.u32 1, %s1113_s18  }
 0x5cc   : > { %s761_s9 = scalar_lea.sflag [#allocation3], %s760_s8 }
 0x5cd   : > { %p938_p3 = pnand %p941_p2, %p1230_p6 }
 0x5cf   : > { %1108 = dma.done.wait (!%p938_p3), %s761_s9, 256  }
 0x5d0   : > { %1110 = vsyncadd (!%p938_p3), %s761_s9, 4294967040  ;;  %p15_p4 = scmp.ge.s32.totalorder %s1213_s24, 4   ;;  %s1443_s18 = smov %s1117_s19 }
 0x5d1   : > { %s1444_s19 = smov %s1121_s20  ;;  %s1445_s20 = smov %s1224_s27 }
 0x5d2   : > { %s1446_s21 = smov %s1213_s24  ;;  %17 = sbr.rel (!%p15_p4) target bundleno = 3 (0x3), region = 93 }
 0x5d9   :  { %766 = vsyncpa [#allocation3], 1 }
 0x5da   :  { %768 = vsyncpa [#allocation3 + $0x1], 1 }

</bundles_post_ra>
